<compile_context>
chip_gen: v6e
topology: v6e:2x2x1
jax: 0.10.0
libtpu: 0.0.40
codegen_flags: <defaults>
</compile_context>

<pallas_src>
import jax
import jax.numpy as jnp
from jax.experimental import pallas as pl
from jax.experimental.pallas import tpu as pltpu


# ------------------------------------------------------------------ kernels


def _to_rgb_kernel(istyle_ref, wst_ref, bst_ref, wconv_ref, x_ref, prev_ref, o_ref):
    """Fused: style = istyle[b] @ Wst + b; Wmod = w_conv*(style+1); rgb = Wmod @ x + prev."""
    b = pl.program_id(0)

    # Style vector for this batch row: (1, L) @ (L, C) + (1, C), in f32.
    sty_in = istyle_ref[pl.ds(b, 1), :].astype(jnp.float32)
    wst = wst_ref[...].astype(jnp.float32)
    bst = bst_ref[...].astype(jnp.float32)
    style = jnp.dot(sty_in, wst, preferred_element_type=jnp.float32) + bst        # (1, C)

    # Modulated 1x1 conv weights (demod=False): (O, C) * (1, C).
    w_mod = wconv_ref[...].astype(jnp.float32) * (style + 1.0)                    # (O, C)

    # 1x1 conv over the flattened (lane-dense) spatial axis: (O, C) @ (C, HW).
    x = x_ref[0].astype(jnp.float32)                                              # (C, HW)
    rgb = jnp.dot(w_mod, x, preferred_element_type=jnp.float32)                   # (O, HW)
    rgb = rgb + prev_ref[0].astype(jnp.float32)

    o_ref[0] = rgb.astype(o_ref.dtype)


def _upsample2x_kernel(uh_ref, uwt_ref, x_ref, o_ref):
    """Bilinear 2x (align_corners=False) as out[o] = U_H @ x[o] @ U_W^T per channel."""
    uh = uh_ref[...].astype(jnp.float32)      # (2H, H)
    uwt = uwt_ref[...].astype(jnp.float32)    # (W, 2W)
    n_chan = x_ref.shape[1]
    for o in range(n_chan):                   # static, tiny (3 or 4 channels)
        xo = x_ref[0, o].astype(jnp.float32)                                      # (H, W)
        t = jnp.dot(uh, xo, preferred_element_type=jnp.float32)                   # (2H, W)
        y = jnp.dot(t, uwt, preferred_element_type=jnp.float32)                   # (2H, 2W)
        o_ref[0, o] = y.astype(o_ref.dtype)


# ------------------------------------------------------------------ wrapper


def _bilinear_upsample_matrix(n):
    """(2n, n) matrix for PyTorch Upsample(scale=2, 'bilinear', align_corners=False)."""
    p = jnp.arange(2 * n, dtype=jnp.float32)
    src = jnp.maximum(p * 0.5 - 0.25, 0.0)
    i0 = jnp.floor(src).astype(jnp.int32)
    i1 = jnp.minimum(i0 + 1, n - 1)
    lam = src - i0.astype(jnp.float32)
    cols = jnp.arange(n, dtype=jnp.int32)
    u = ((cols[None, :] == i0[:, None]).astype(jnp.float32) * (1.0 - lam)[:, None]
         + (cols[None, :] == i1[:, None]).astype(jnp.float32) * lam[:, None])
    return u


def rgb_block_forward(x, prev_rgb, istyle, style_w, style_b, conv_w, *, upsample=True):
    """Pallas forward for RGBBlock.

    x:        (B, C, H, W) feature map
    prev_rgb: (B, O, H, W) or None
    istyle:   (B, L) latent
    style_w:  (C, L) nn.Linear(latent_dim, input_channel).weight
    style_b:  (C,)   nn.Linear bias
    conv_w:   (O, C, 1, 1) Conv2DMod weight (kernel=1, demod=False -> padding 0)
    """
    B, C, H, W = x.shape
    L = istyle.shape[1]
    O = conv_w.shape[0]
    HW = H * W
    itemsize = jnp.dtype(x.dtype).itemsize

    x_flat = x.reshape(B, C, HW)                              # lane-dense spatial axis
    if prev_rgb is None:
        prev_flat = jnp.zeros((B, O, HW), dtype=x.dtype)
    else:
        prev_flat = prev_rgb.reshape(B, O, HW)
    wst = jnp.transpose(style_w)                              # (L, C)
    bst = style_b.reshape(1, C)
    wconv = conv_w.reshape(O, C)

    cost = pl.CostEstimate(
        flops=2 * B * L * C + 2 * B * O * C * HW + 2 * B * O * HW,
        transcendentals=0,
        bytes_accessed=(B * C * HW + 2 * B * O * HW + B * L) * itemsize
        + (L * C + C + O * C) * itemsize,
    )

    rgb_flat = pl.pallas_call(
        _to_rgb_kernel,
        out_shape=jax.ShapeDtypeStruct((B, O, HW), x.dtype),
        grid_spec=pltpu.PrefetchScalarGridSpec(
            num_scalar_prefetch=0,
            grid=(B,),
            in_specs=[
                pl.BlockSpec((B, L), lambda b: (0, 0)),         # istyle (resident)
                pl.BlockSpec((L, C), lambda b: (0, 0)),         # style weight^T
                pl.BlockSpec((1, C), lambda b: (0, 0)),         # style bias
                pl.BlockSpec((O, C), lambda b: (0, 0)),         # conv weight
                pl.BlockSpec((1, C, HW), lambda b: (b, 0, 0)),  # x tile (per batch)
                pl.BlockSpec((1, O, HW), lambda b: (b, 0, 0)),  # prev rgb tile
            ],
            out_specs=pl.BlockSpec((1, O, HW), lambda b: (b, 0, 0)),
        ),
        compiler_params=pltpu.CompilerParams(dimension_semantics=("parallel",)),
        cost_estimate=cost,
    )(istyle, wst, bst, wconv, x_flat, prev_flat)

    if not upsample:
        return rgb_flat.reshape(B, O, H, W)

    rgb4 = rgb_flat.reshape(B, O, H, W)                       # free contiguous reshape
    uh = _bilinear_upsample_matrix(H)                         # (2H, H)
    uwt = jnp.transpose(_bilinear_upsample_matrix(W))         # (W, 2W)

    up_cost = pl.CostEstimate(
        flops=2 * B * O * (2 * H * H * W + 2 * H * W * 2 * W),
        transcendentals=0,
        bytes_accessed=(B * O * HW + B * O * 4 * HW) * itemsize
        + (2 * H * H + W * 2 * W) * 4,
    )

    return pl.pallas_call(
        _upsample2x_kernel,
        out_shape=jax.ShapeDtypeStruct((B, O, 2 * H, 2 * W), x.dtype),
        grid_spec=pltpu.PrefetchScalarGridSpec(
            num_scalar_prefetch=0,
            grid=(B,),
            in_specs=[
                pl.BlockSpec((2 * H, H), lambda b: (0, 0)),           # U_H (resident)
                pl.BlockSpec((W, 2 * W), lambda b: (0, 0)),           # U_W^T (resident)
                pl.BlockSpec((1, O, H, W), lambda b: (b, 0, 0, 0)),   # rgb tile
            ],
            out_specs=pl.BlockSpec((1, O, 2 * H, 2 * W), lambda b: (b, 0, 0, 0)),
        ),
        compiler_params=pltpu.CompilerParams(dimension_semantics=("parallel",)),
        cost_estimate=up_cost,
    )(uh, uwt, rgb4)


# ------------------------------------------------------------------ pure-JAX reference


def _upsample2x_reference(x):
    def interp(a, axis, n):
        p = jnp.arange(2 * n, dtype=jnp.float32)
        src = jnp.maximum(p * 0.5 - 0.25, 0.0)
        i0 = jnp.floor(src).astype(jnp.int32)
        i1 = jnp.minimum(i0 + 1, n - 1)
        lam = src - i0.astype(jnp.float32)
        a0 = jnp.take(a, i0, axis=axis)
        a1 = jnp.take(a, i1, axis=axis)
        shape = [1] * a.ndim
        shape[axis] = 2 * n
        lam = lam.reshape(shape)
        return a0 * (1.0 - lam) + a1 * lam

    x = interp(x, 2, x.shape[2])
    x = interp(x, 3, x.shape[3])
    return x


def _reference(x, prev_rgb, istyle, style_w, style_b, conv_w, *, upsample=True):
    style = istyle @ style_w.T + style_b                        # (B, C)
    w = conv_w.reshape(conv_w.shape[0], conv_w.shape[1])        # (O, C)
    w_mod = w[None, :, :] * (style[:, None, :] + 1.0)           # (B, O, C)
    rgb = jnp.einsum("boc,bchw->bohw", w_mod, x)
    if prev_rgb is not None:
        rgb = rgb + prev_rgb
    if upsample:
        rgb = _upsample2x_reference(rgb)
    return rgb


# ------------------------------------------------------------------ demo / self-check


if __name__ == "__main__":
    key = jax.random.PRNGKey(0)
    B, C, H, W = 2, 4, 16, 16
    L = 32          # latent_dim
    O = 3           # rgba=False -> 3 output filters

    k = jax.random.split(key, 6)
    x = jax.random.normal(k[0], (B, C, H, W), dtype=jnp.float32)
    prev_rgb = jax.random.normal(k[1], (B, O, H, W), dtype=jnp.float32)
    istyle = jax.random.normal(k[2], (B, L), dtype=jnp.float32)
    style_w = jax.random.normal(k[3], (C, L), dtype=jnp.float32) * 0.1
    style_b = jax.random.normal(k[4], (C,), dtype=jnp.float32) * 0.1
    conv_w = jax.random.normal(k[5], (O, C, 1, 1), dtype=jnp.float32)

    # Full path: modulated 1x1 conv + prev_rgb residual + 2x bilinear upsample.
    out = rgb_block_forward(x, prev_rgb, istyle, style_w, style_b, conv_w, upsample=True)
    out = jax.block_until_ready(out)
    ref = _reference(x, prev_rgb, istyle, style_w, style_b, conv_w, upsample=True)
    assert out.shape == (B, O, 2 * H, 2 * W), out.shape
    assert jnp.allclose(out, ref, atol=1e-4, rtol=1e-4), "mismatch (upsample=True)"

    # No-prev / no-upsample path (prev_rgb=None branch of the module).
    out2 = rgb_block_forward(x, None, istyle, style_w, style_b, conv_w, upsample=False)
    out2 = jax.block_until_ready(out2)
    ref2 = _reference(x, None, istyle, style_w, style_b, conv_w, upsample=False)
    assert out2.shape == (B, O, H, W), out2.shape
    assert jnp.allclose(out2, ref2, atol=1e-4, rtol=1e-4), "mismatch (upsample=False)"

    print("KERNEL_OK")
</pallas_src>

<mosaic_0001>
module attributes {stable_mosaic.version = 11 : i64} {
  func.func @_to_rgb_kernel(%arg0: i32, %arg1: memref<2x32xf32, #tpu.memory_space<vmem>>, %arg2: memref<32x4xf32, #tpu.memory_space<vmem>>, %arg3: memref<1x4xf32, #tpu.memory_space<vmem>>, %arg4: memref<3x4xf32, #tpu.memory_space<vmem>>, %arg5: memref<1x4x256xf32, #tpu.memory_space<vmem>>, %arg6: memref<1x3x256xf32, #tpu.memory_space<vmem>>, %arg7: memref<1x3x256xf32, #tpu.memory_space<vmem>>) attributes {dimension_semantics = [#tpu.dimension_semantics<parallel>], iteration_bounds = array<i64: 2>, scalar_prefetch = 0 : i64, scratch_operands = 0 : i64, tpu.core_type = #tpu.core_type<tc>, window_params = [{pipeline_mode = #tpu.pipeline_mode<synchronous>, transform_indices = @transform_0, window_bounds = array<i64: 2, 32>}, {pipeline_mode = #tpu.pipeline_mode<synchronous>, transform_indices = @transform_1, window_bounds = array<i64: 32, 4>}, {pipeline_mode = #tpu.pipeline_mode<synchronous>, transform_indices = @transform_2, window_bounds = array<i64: 1, 4>}, {pipeline_mode = #tpu.pipeline_mode<synchronous>, transform_indices = @transform_3, window_bounds = array<i64: 3, 4>}, {transform_indices = @transform_4, window_bounds = array<i64: 1, 4, 256>}, {transform_indices = @transform_5, window_bounds = array<i64: 1, 3, 256>}, {transform_indices = @transform_6, window_bounds = array<i64: 1, 3, 256>}]} {
    %0 = arith.index_cast %arg0 : i32 to index
    %c0 = arith.constant 0 : index
    %1 = vector.load %arg1[%0, %c0] : memref<2x32xf32, #tpu.memory_space<vmem>>, vector<1x32xf32>
    %c0_0 = arith.constant 0 : index
    %c0_1 = arith.constant 0 : index
    %2 = vector.load %arg2[%c0_0, %c0_1] : memref<32x4xf32, #tpu.memory_space<vmem>>, vector<32x4xf32>
    %c0_2 = arith.constant 0 : index
    %c0_3 = arith.constant 0 : index
    %3 = vector.load %arg3[%c0_2, %c0_3] : memref<1x4xf32, #tpu.memory_space<vmem>>, vector<1x4xf32>
    %cst = arith.constant dense<0.000000e+00> : vector<1x4xf32>
    %4 = tpu.matmul %1, %2, %cst {dimension_numbers = #tpu.dot_dimension_numbers<[1], [0], [0], [1], [0, 0, 1, 1], [], []>} : vector<1x32xf32>, vector<32x4xf32>, vector<1x4xf32> -> vector<1x4xf32>
    %5 = arith.addf %4, %3 : vector<1x4xf32>
    %c0_4 = arith.constant 0 : index
    %c0_5 = arith.constant 0 : index
    %6 = vector.load %arg4[%c0_4, %c0_5] : memref<3x4xf32, #tpu.memory_space<vmem>>, vector<3x4xf32>
    %cst_6 = arith.constant 1.000000e+00 : f32
    %7 = vector.broadcast %cst_6 : f32 to vector<1x4xf32>
    %8 = arith.addf %5, %7 : vector<1x4xf32>
    %9 = vector.broadcast %8 : vector<1x4xf32> to vector<3x4xf32>
    %10 = arith.mulf %6, %9 : vector<3x4xf32>
    %c0_7 = arith.constant 0 : index
    %c0_8 = arith.constant 0 : index
    %c0_9 = arith.constant 0 : index
    %11 = vector.load %arg5[%c0_7, %c0_8, %c0_9] : memref<1x4x256xf32, #tpu.memory_space<vmem>>, vector<1x4x256xf32>
    %12 = vector.shape_cast %11 : vector<1x4x256xf32> to vector<4x256xf32>
    %cst_10 = arith.constant dense<0.000000e+00> : vector<3x256xf32>
    %13 = tpu.matmul %10, %12, %cst_10 {dimension_numbers = #tpu.dot_dimension_numbers<[1], [0], [0], [1], [0, 0, 1, 1], [], []>} : vector<3x4xf32>, vector<4x256xf32>, vector<3x256xf32> -> vector<3x256xf32>
    %c0_11 = arith.constant 0 : index
    %c0_12 = arith.constant 0 : index
    %c0_13 = arith.constant 0 : index
    %14 = vector.load %arg6[%c0_11, %c0_12, %c0_13] : memref<1x3x256xf32, #tpu.memory_space<vmem>>, vector<1x3x256xf32>
    %15 = vector.shape_cast %14 : vector<1x3x256xf32> to vector<3x256xf32>
    %16 = arith.addf %13, %15 : vector<3x256xf32>
    %c0_14 = arith.constant 0 : index
    %c0_15 = arith.constant 0 : index
    %c0_16 = arith.constant 0 : index
    %17 = vector.load %arg7[%c0_14, %c0_15, %c0_16] : memref<1x3x256xf32, #tpu.memory_space<vmem>>, vector<1x3x256xf32>
    %18 = vector.shape_cast %17 : vector<1x3x256xf32> to vector<3x256xf32>
    %19 = vector.shape_cast %16 : vector<3x256xf32> to vector<1x3x256xf32>
    tpu.vector_store %arg7[%c0_14, %c0_15, %c0_16], %19 {strides = array<i32>} : memref<1x3x256xf32, #tpu.memory_space<vmem>>, vector<1x3x256xf32>,
    return
  }
  func.func @transform_0(%arg0: i32) -> (i32, i32) {
    %c0_i32 = arith.constant 0 : i32
    %c0_i32_0 = arith.constant 0 : i32
    %c0_i32_1 = arith.constant 0 : i32
    return %c0_i32, %c0_i32_0 : i32, i32
  }
  func.func @transform_1(%arg0: i32) -> (i32, i32) {
    %c0_i32 = arith.constant 0 : i32
    %c0_i32_0 = arith.constant 0 : i32
    %c0_i32_1 = arith.constant 0 : i32
    return %c0_i32, %c0_i32_0 : i32, i32
  }
  func.func @transform_2(%arg0: i32) -> (i32, i32) {
    %c0_i32 = arith.constant 0 : i32
    %c0_i32_0 = arith.constant 0 : i32
    %c0_i32_1 = arith.constant 0 : i32
    return %c0_i32, %c0_i32_0 : i32, i32
  }
  func.func @transform_3(%arg0: i32) -> (i32, i32) {
    %c0_i32 = arith.constant 0 : i32
    %c0_i32_0 = arith.constant 0 : i32
    %c0_i32_1 = arith.constant 0 : i32
    return %c0_i32, %c0_i32_0 : i32, i32
  }
  func.func @transform_4(%arg0: i32) -> (i32, i32, i32) {
    %c0_i32 = arith.constant 0 : i32
    %c0_i32_0 = arith.constant 0 : i32
    %c0_i32_1 = arith.constant 0 : i32
    return %arg0, %c0_i32, %c0_i32_0 : i32, i32, i32
  }
  func.func @transform_5(%arg0: i32) -> (i32, i32, i32) {
    %c0_i32 = arith.constant 0 : i32
    %c0_i32_0 = arith.constant 0 : i32
    %c0_i32_1 = arith.constant 0 : i32
    return %arg0, %c0_i32, %c0_i32_0 : i32, i32, i32
  }
  func.func @transform_6(%arg0: i32) -> (i32, i32, i32) {
    %c0_i32 = arith.constant 0 : i32
    %c0_i32_0 = arith.constant 0 : i32
    %c0_i32_1 = arith.constant 0 : i32
    return %arg0, %c0_i32, %c0_i32_0 : i32, i32, i32
  }
}

</mosaic_0001>

<bundles_post_ra>
// kernel: tpu_custom_call.1
= control target key start
LH: loop header
LB: loop body
LE: loop exit
PB: predicated region body
PF: predicated region fallthrough
CT: control target
= control target key end

     0   :  { %s613_s21 = smov 0   ;;  %s659_s0 = inlined_call_operand.vmem [shape: f32[2,32], index: 0, kind: input, shape index: {}]   ;;  %s660_s1 = inlined_call_operand.vmem [shape: f32[32,4], index: 1, kind: input, shape index: {}]   ;;  %s661_s2 = inlined_call_operand.vmem [shape: f32[1,4], index: 2, kind: input, shape index: {}]   ;;  %s662_s3 = inlined_call_operand.vmem [shape: f32[3,4], index: 3, kind: input, shape index: {}]   ;;  %s663_s4 = inlined_call_operand.vmem [shape: f32[2,4,256], index: 4, kind: input, shape index: {}]   ;;  %s664_s5 = inlined_call_operand.vmem [shape: f32[2,3,256], index: 5, kind: input, shape index: {}]   ;;  %s665_s6 = inlined_call_operand.vmem [shape: f32[2,3,256], index: 6, kind: output, shape index: {}]  }
   0x1 LB: > { %s520_s22 = sadd.s32 4294967295, %s574_s21   ;;  %p524_p0 = scmp.ge.s32.totalorder %s574_s21, 1  ;;  %s574_s21 = sphi %s613_s21, %s16_s21  }
   0x2   : > { %p222_p1 = scmp.lt.s32.totalorder %s574_s21, 3 }
   0x4   : > { %p223_p2 = pnand %p524_p0, %p222_p1 }
   0x5   : > { %s272_s7 = scalar_lea.vmem (!%p223_p2), %s659_s0, %s520_s22  ;;  %p257_p3 = scmp.lt.s32.totalorder (!%p223_p2), %s520_s22, 1 }
   0x6   : > { %226 = sbr.rel (%p223_p2) target bundleno = 421 (0x1a5), region = 44 }
   0xb   : > { %v277_v0 = vld [vmem:[%s660_s1 + $0x18] sm:$0xff]  ;;  %v576_v1 = vmov 0.0   ;;  %v276_v2 = vld [vmem:[%s660_s1 + $0x10] sm:$0xff]  ;;  %vm577_vm0 = vmmov 0   ;;  %v275_v3 = vld [vmem:[%s660_s1 + $0x8] sm:$0xff]  ;;  %vm279_vm1 = vcmask 261120   ;;  %v355_v8 = vlaneseq }
   0xc   : > { %545 = vmatprep.subr.mxu0 %v576_v1  ;;  %553 = vmatprep.mubr.msk.f32.mxu0 %vm577_vm0, %v576_v1  ;;  %v274_v4 = vld [vmem:[%s660_s1] sm:$0xff]  ;;  %s667_s22 = smov (!%p257_p3, %s520_s22), 1  ;;  %vm371_vm2 = vcmask 1043456   ;;  %vm367_vm3 = vcmask 31744  }
   0xd   : > { %546 = vmatpush3.msra.mxu0 %v277_v0  ;;  %440 = vmatprep.mubr.f32.mxu1 %v576_v1  ;;  %v273_v5 = vld [vmem:[%s272_s7] sm:$0x1]  ;;  %s636_s10 = sshll.u32 %s667_s22, 3  ;;  %v356_v9 = vshrl.u32 %v355_v8, 7 }
   0xe   : > { %547 = vmatprep.subr.mxu0 %v576_v1  ;;  %s261_s13 = scalar_lea.vmem %s663_s4, %s636_s10  ;;  %v278_v10 = vld [vmem:[%s661_s2] sm:$0x1]  ;;  %s266_s20 = scalar_lea.vmem %s664_s5, %s636_s10 }
   0xf   : > { %548 = vmatpush3.msra.mxu0 %v276_v2  ;;  %v360_v6 = vld [vmem:[%s261_s13] sm:$0xff]  ;;  %v357_v13 = vsub.s32 0, %v356_v9  ;;  %s271_s24 = scalar_lea.vmem %s665_s6, %s636_s10 }
  0x10   : > { %549 = vmatprep.subr.mxu0 %v576_v1  ;;  %v363_v7 = vcombine.high %v360_v6, %v360_v6  ;;  %v353_v16 = vld [vmem:[%s662_s3] sm:$0x7] }
  0x11   : > { %550 = vmatpush3.msra.mxu0 %v275_v3  ;;  %v361_v19 = vld [vmem:[%s266_s20] sm:$0x77] }
  0x12   : > { %551 = vmatprep.subr.mxu0 %v576_v1  ;;  %532 = vmatprep.subr.msk.mxu1 %vm371_vm2, %v363_v7  ;;  %v365_v20 = vcombine.high %v361_v19, %v361_v19 }
  0x13   : > { %552 = vmatpush3.msra.mxu0 %v274_v4  ;;  %533 = vmatpush1.msk.msra.mxu1 %vm371_vm2, %v360_v6 }
  0x14   : > { %554 = vmatmul.mubr.msk.f32.vlgmr.msra.gmra.mxu0 %vm279_vm1, %v273_v5 }
  0xd4   : > { %v349_v11 = vpop.f32.mrf.mxu0 }
  0xd5   : > { %v350_v12 = vadd.f32 %v349_v11, %v278_v10 }
  0xd6   : > { %v555_v14 = vpop.f32.mrf.mxu0 }
  0xd7   : > { %v354_v15 = vadd.f32 1.0, %v350_v12 }
  0xd9   : > { %v358_v17 = vrot.slane %v354_v15, %v357_v13 }
  0xdb   : > { %v359_v18 = vmul.f32 %v358_v17, %v353_v16 }
  0xdd   : > { %534 = vmatmul.mubr.msk.f32.vlgmr.msra.gmra.mxu1 %vm367_vm3, %v359_v18 }
 0x19d   : > { %v442_v21 = vpop.f32.mrf.mxu1 }
 0x19e   : > { %v443_v23 = vadd.f32 %v442_v21, %v361_v19 }
 0x19f   : > { %v444_v22 = vpop.f32.mrf.mxu1 }
 0x1a0   : > { %v445_v24 = vadd.f32 %v444_v22, %v365_v20 }
 0x1a2   : > { %v449_v25 = vcombine.low %v443_v23, %v445_v24 }
 0x1a4   : > { %451 = vst [vmem:[%s271_s24] sm:$0x77] %v449_v25 }
 0x1a5 PF: > { %s16_s21 = sadd.s32 1, %s574_s21  }
 0x1a6   : > { %p13_p4 = scmp.ge.s32.totalorder %s16_s21, 4  }
 0x1a8   :  { %15 = sbr.rel (!%p13_p4) target bundleno = 1 (0x1), region = 78 }

</bundles_post_ra>
